<compile_context>
chip_gen: v7x
topology: tpu7x:2x2x1
jax: 0.10.0
libtpu: 0.0.40
codegen_flags: <defaults>
</compile_context>

<pallas_src>
import functools

import jax
import jax.numpy as jnp
from jax import lax
from jax.experimental import pallas as pl
from jax.experimental.pallas import tpu as pltpu

EPS = 1e-5  # nn.InstanceNorm2d default eps


def _round_up(x, m):
    return (x + m - 1) // m * m


@functools.partial(jax.jit, static_argnames=("kernel_size",))
def gated_conv(x_nchw, wc, bc, wm, bm, kernel_size):
    """x_nchw: [N, Cin, H, W]; wc/wm: [Cout, Cin, K, K]; bc/bm: [Cout]."""
    N, Cin, H, W = x_nchw.shape
    Cout = wc.shape[0]
    K = kernel_size
    OH, OW = H - K + 1, W - K + 1            # stride=1, dilation=1, padding=0
    OHW = OH * W                             # full-width valid rows (cols >= OW are scrap)
    OHW_pad = _round_up(OHW, 128)            # lane-dense -> unmasked stores
    KKC = K * K * Cin
    C2 = 2 * Cout
    max_off = (K - 1) * W + (K - 1)
    HWP = _round_up(max_off + OHW_pad, 128)  # flat spatial + slack so every tap window fits

    # --- glue (no K^2 read amplification): flatten spatial, zero-pad lanes, cast bf16.
    x_flat = x_nchw.reshape(N, Cin, H * W)
    x_flat = jnp.pad(x_flat, ((0, 0), (0, 0), (0, HWP - H * W))).astype(jnp.bfloat16)

    # --- fuse conv + mask weights into one [2*Cout, K*K*Cin] matrix.
    # Column order (kh*K + kw)*Cin + cin matches the in-kernel patch stacking.
    def flatten_w(w):  # [Cout, Cin, K, K] -> [Cout, K*K*Cin]
        return jnp.transpose(w, (0, 2, 3, 1)).reshape(Cout, KKC)

    w_fused = jnp.concatenate([flatten_w(wc), flatten_w(wm)], axis=0).astype(jnp.bfloat16)
    b_fused = jnp.concatenate([bc, bm]).reshape(C2, 1).astype(jnp.float32)

    inv_cnt = 1.0 / float(OH * OW)

    def kernel(x_ref, w_ref, b_ref, o_ref):
        # x_ref: (1, Cin, HWP) bf16   w_ref: (C2, KKC) bf16
        # b_ref: (C2, 1) f32          o_ref: (1, Cout, OHW_pad) f32
        taps = []
        for s in range(K * K):                              # static unroll: build patch
            kh, kw = s // K, s % K
            off = kh * W + kw
            taps.append(x_ref[0, :, off:off + OHW_pad])     # [Cin, OHW_pad] shifted window
        patch = jnp.concatenate(taps, axis=0)               # [K*K*Cin, OHW_pad]

        # Single fused conv+mask matmul, contraction depth = K*K*Cin.
        acc = jnp.dot(w_ref[...], patch, preferred_element_type=jnp.float32)
        acc = acc + b_ref[...]

        # x = relu(conv(x)) * sigmoid(mask(x))
        g = jnp.maximum(acc[:Cout], 0.0) * jax.nn.sigmoid(acc[Cout:])    # [Cout, OHW_pad]

        # InstanceNorm2d (no affine): single masked pass over VALID spatial cols only
        # (exclude scrap cols col%W >= OW and pad cols col >= OH*W).
        col = lax.broadcasted_iota(jnp.int32, (Cout, OHW_pad), 1)
        valid = ((col % W) < OW) & (col < OHW)
        gz = jnp.where(valid, g, 0.0)
        mean = jnp.sum(gz, axis=1, keepdims=True) * inv_cnt
        ex2 = jnp.sum(gz * gz, axis=1, keepdims=True) * inv_cnt
        var = jnp.maximum(ex2 - mean * mean, 0.0)
        o_ref[0] = (g - mean) * lax.rsqrt(var + EPS)

    out = pl.pallas_call(
        kernel,
        out_shape=jax.ShapeDtypeStruct((N, Cout, OHW_pad), jnp.float32),
        grid_spec=pltpu.PrefetchScalarGridSpec(
            num_scalar_prefetch=0,
            grid=(N,),
            in_specs=[
                pl.BlockSpec((1, Cin, HWP), lambda n: (n, 0, 0)),
                pl.BlockSpec((C2, KKC), lambda n: (0, 0)),
                pl.BlockSpec((C2, 1), lambda n: (0, 0)),
            ],
            out_specs=pl.BlockSpec((1, Cout, OHW_pad), lambda n: (n, 0, 0)),
        ),
        compiler_params=pltpu.CompilerParams(
            dimension_semantics=("parallel",)),
    )(x_flat, w_fused, b_fused)

    # Lane-dense [Cout, OHW_pad] already matches NCHW row-major: drop pad + scrap
    # columns for this standalone test (a production consumer can keep the
    # full-width layout and fold the drop into the next op to avoid the copy).
    return out[:, :, :OHW].reshape(N, Cout, OH, W)[:, :, :, :OW]


def gated_conv_reference(x, wc, bc, wm, bm):
    """Pure-JAX reference mirroring the PyTorch forward (NCHW, padding=0)."""
    dn = lax.conv_dimension_numbers(x.shape, wc.shape, ('NCHW', 'OIHW', 'NCHW'))
    conv = lax.conv_general_dilated(x, wc, (1, 1), 'VALID',
                                    dimension_numbers=dn) + bc[None, :, None, None]
    mask = lax.conv_general_dilated(x, wm, (1, 1), 'VALID',
                                    dimension_numbers=dn) + bm[None, :, None, None]
    g = jnp.maximum(conv, 0.0) * jax.nn.sigmoid(mask)
    mean = jnp.mean(g, axis=(2, 3), keepdims=True)
    var = jnp.mean((g - mean) ** 2, axis=(2, 3), keepdims=True)
    return (g - mean) * lax.rsqrt(var + EPS)


if __name__ == "__main__":
    # GatedConv(in_channels=4, out_channels=8, kernel_size=3) with defaults
    # (stride=1, dilation=1, groups=1, bias=True, padding=0, norm='in',
    #  activation='relu', pad_type='zero').
    N, Cin, Cout, H, W, K = 2, 4, 8, 16, 16, 3

    key = jax.random.PRNGKey(0)
    kx, kwc, kbc, kwm, kbm = jax.random.split(key, 5)
    x = jax.random.normal(kx, (N, Cin, H, W), jnp.float32)
    wc = 0.1 * jax.random.normal(kwc, (Cout, Cin, K, K), jnp.float32)
    bc = 0.1 * jax.random.normal(kbc, (Cout,), jnp.float32)
    wm = 0.1 * jax.random.normal(kwm, (Cout, Cin, K, K), jnp.float32)
    bm = 0.1 * jax.random.normal(kbm, (Cout,), jnp.float32)

    y = gated_conv(x, wc, bc, wm, bm, kernel_size=K)
    jax.block_until_ready(y)

    # Reference on bf16-quantized inputs (kernel matmul runs in bf16 with f32 acc).
    q = lambda a: a.astype(jnp.bfloat16).astype(jnp.float32)
    y_ref = gated_conv_reference(q(x), q(wc), bc, q(wm), bm)

    assert y.shape == (N, Cout, H - K + 1, W - K + 1)
    err = float(jnp.max(jnp.abs(y - y_ref)))
    assert jnp.allclose(y, y_ref, atol=1e-2, rtol=1e-2), f"max abs err {err}"
    print("KERNEL_OK")
</pallas_src>

<mosaic_0001>
module attributes {stable_mosaic.version = 11 : i64} {
  func.func @kernel(%arg0: i32, %arg1: memref<1x4x384xbf16, #tpu.memory_space<vmem>>, %arg2: memref<16x36xbf16, #tpu.memory_space<vmem>>, %arg3: memref<16x1xf32, #tpu.memory_space<vmem>>, %arg4: memref<1x8x256xf32, #tpu.memory_space<vmem>>) attributes {dimension_semantics = [#tpu.dimension_semantics<parallel>], iteration_bounds = array<i64: 2>, scalar_prefetch = 0 : i64, scratch_operands = 0 : i64, tpu.core_type = #tpu.core_type<tc>, window_params = [{transform_indices = @transform_0, window_bounds = array<i64: 1, 4, 384>}, {pipeline_mode = #tpu.pipeline_mode<synchronous>, transform_indices = @transform_1, window_bounds = array<i64: 16, 36>}, {pipeline_mode = #tpu.pipeline_mode<synchronous>, transform_indices = @transform_2, window_bounds = array<i64: 16, 1>}, {transform_indices = @transform_3, window_bounds = array<i64: 1, 8, 256>}]} {
    %c0 = arith.constant 0 : index
    %c0_0 = arith.constant 0 : index
    %c0_1 = arith.constant 0 : index
    %0 = vector.load %arg1[%c0, %c0_0, %c0_1] : memref<1x4x384xbf16, #tpu.memory_space<vmem>>, vector<1x4x256xbf16>
    %1 = vector.shape_cast %0 : vector<1x4x256xbf16> to vector<4x256xbf16>
    %c0_2 = arith.constant 0 : index
    %c0_3 = arith.constant 0 : index
    %c1 = arith.constant 1 : index
    %2 = vector.load %arg1[%c0_2, %c0_3, %c1] : memref<1x4x384xbf16, #tpu.memory_space<vmem>>, vector<1x4x256xbf16>
    %3 = vector.shape_cast %2 : vector<1x4x256xbf16> to vector<4x256xbf16>
    %c0_4 = arith.constant 0 : index
    %c0_5 = arith.constant 0 : index
    %c2 = arith.constant 2 : index
    %4 = vector.load %arg1[%c0_4, %c0_5, %c2] : memref<1x4x384xbf16, #tpu.memory_space<vmem>>, vector<1x4x256xbf16>
    %5 = vector.shape_cast %4 : vector<1x4x256xbf16> to vector<4x256xbf16>
    %c0_6 = arith.constant 0 : index
    %c0_7 = arith.constant 0 : index
    %c16 = arith.constant 16 : index
    %6 = vector.load %arg1[%c0_6, %c0_7, %c16] : memref<1x4x384xbf16, #tpu.memory_space<vmem>>, vector<1x4x256xbf16>
    %7 = vector.shape_cast %6 : vector<1x4x256xbf16> to vector<4x256xbf16>
    %c0_8 = arith.constant 0 : index
    %c0_9 = arith.constant 0 : index
    %c17 = arith.constant 17 : index
    %8 = vector.load %arg1[%c0_8, %c0_9, %c17] : memref<1x4x384xbf16, #tpu.memory_space<vmem>>, vector<1x4x256xbf16>
    %9 = vector.shape_cast %8 : vector<1x4x256xbf16> to vector<4x256xbf16>
    %c0_10 = arith.constant 0 : index
    %c0_11 = arith.constant 0 : index
    %c18 = arith.constant 18 : index
    %10 = vector.load %arg1[%c0_10, %c0_11, %c18] : memref<1x4x384xbf16, #tpu.memory_space<vmem>>, vector<1x4x256xbf16>
    %11 = vector.shape_cast %10 : vector<1x4x256xbf16> to vector<4x256xbf16>
    %c0_12 = arith.constant 0 : index
    %c0_13 = arith.constant 0 : index
    %c32 = arith.constant 32 : index
    %12 = vector.load %arg1[%c0_12, %c0_13, %c32] : memref<1x4x384xbf16, #tpu.memory_space<vmem>>, vector<1x4x256xbf16>
    %13 = vector.shape_cast %12 : vector<1x4x256xbf16> to vector<4x256xbf16>
    %c0_14 = arith.constant 0 : index
    %c0_15 = arith.constant 0 : index
    %c33 = arith.constant 33 : index
    %14 = vector.load %arg1[%c0_14, %c0_15, %c33] : memref<1x4x384xbf16, #tpu.memory_space<vmem>>, vector<1x4x256xbf16>
    %15 = vector.shape_cast %14 : vector<1x4x256xbf16> to vector<4x256xbf16>
    %c0_16 = arith.constant 0 : index
    %c0_17 = arith.constant 0 : index
    %c34 = arith.constant 34 : index
    %16 = vector.load %arg1[%c0_16, %c0_17, %c34] : memref<1x4x384xbf16, #tpu.memory_space<vmem>>, vector<1x4x256xbf16>
    %17 = vector.shape_cast %16 : vector<1x4x256xbf16> to vector<4x256xbf16>
    %18 = tpu.concatenate %1, %3, %5, %7, %9, %11, %13, %15, %17 in 0 : vector<4x256xbf16>, vector<4x256xbf16>, vector<4x256xbf16>, vector<4x256xbf16>, vector<4x256xbf16>, vector<4x256xbf16>, vector<4x256xbf16>, vector<4x256xbf16>, vector<4x256xbf16> -> vector<36x256xbf16>
    %c0_18 = arith.constant 0 : index
    %c0_19 = arith.constant 0 : index
    %19 = vector.load %arg2[%c0_18, %c0_19] : memref<16x36xbf16, #tpu.memory_space<vmem>>, vector<16x36xbf16>
    %cst = arith.constant dense<0.000000e+00> : vector<16x256xf32>
    %20 = tpu.matmul %19, %18, %cst {dimension_numbers = #tpu.dot_dimension_numbers<[1], [0], [0], [1], [0, 0, 1, 1], [], []>} : vector<16x36xbf16>, vector<36x256xbf16>, vector<16x256xf32> -> vector<16x256xf32>
    %c0_20 = arith.constant 0 : index
    %c0_21 = arith.constant 0 : index
    %21 = vector.load %arg3[%c0_20, %c0_21] : memref<16x1xf32, #tpu.memory_space<vmem>>, vector<16x1xf32>
    %22 = vector.broadcast %21 : vector<16x1xf32> to vector<16x256xf32>
    %23 = arith.addf %20, %22 : vector<16x256xf32>
    %24 = vector.extract_strided_slice %23 {offsets = [0, 0], sizes = [8, 256], strides = [1, 1]} : vector<16x256xf32> to vector<8x256xf32>
    %cst_22 = arith.constant 0.000000e+00 : f32
    %25 = vector.broadcast %cst_22 : f32 to vector<8x256xf32>
    %26 = arith.maximumf %24, %25 : vector<8x256xf32>
    %27 = vector.extract_strided_slice %23 {offsets = [8, 0], sizes = [8, 256], strides = [1, 1]} : vector<16x256xf32> to vector<8x256xf32>
    %28 = arith.negf %27 : vector<8x256xf32>
    %29 = math.exp %28 : vector<8x256xf32>
    %cst_23 = arith.constant 1.000000e+00 : f32
    %30 = vector.broadcast %cst_23 : f32 to vector<8x256xf32>
    %31 = arith.addf %30, %29 : vector<8x256xf32>
    %32 = arith.divf %30, %31 : vector<8x256xf32>
    %33 = arith.mulf %26, %32 : vector<8x256xf32>
    %34 = tpu.iota {dimensions = array<i32: 1>} : vector<8x256xi32>
    %c16_i32 = arith.constant 16 : i32
    %c0_i32 = arith.constant 0 : i32
    %35 = arith.cmpi eq, %c16_i32, %c0_i32 : i32
    %c1_i32 = arith.constant 1 : i32
    %36 = arith.select %35, %c1_i32, %c16_i32 : i32
    %37 = vector.broadcast %36 : i32 to vector<8x256xi32>
    %38 = arith.remsi %34, %37 : vector<8x256xi32>
    %c0_i32_24 = arith.constant 0 : i32
    %39 = vector.broadcast %c0_i32_24 : i32 to vector<8x256xi32>
    %40 = arith.cmpi ne, %38, %39 : vector<8x256xi32>
    %c0_i32_25 = arith.constant 0 : i32
    %41 = vector.broadcast %c0_i32_25 : i32 to vector<8x256xi32>
    %42 = arith.cmpi slt, %38, %41 : vector<8x256xi32>
    %c0_i32_26 = arith.constant 0 : i32
    %43 = arith.cmpi slt, %36, %c0_i32_26 : i32
    %44 = vector.broadcast %43 : i1 to vector<8x256xi1>
    %45 = vector.broadcast %44 : vector<8x256xi1> to vector<8x256xi1>
    %46 = arith.xori %42, %45 : vector<8x256xi1>
    %47 = arith.andi %46, %40 : vector<8x256xi1>
    %48 = vector.broadcast %36 : i32 to vector<8x256xi32>
    %49 = arith.addi %38, %48 : vector<8x256xi32>
    %50 = arith.select %47, %49, %38 : vector<8x256xi1>, vector<8x256xi32>
    %c14_i32 = arith.constant 14 : i32
    %51 = vector.broadcast %c14_i32 : i32 to vector<8x256xi32>
    %52 = arith.cmpi slt, %50, %51 : vector<8x256xi32>
    %c224_i32 = arith.constant 224 : i32
    %53 = vector.broadcast %c224_i32 : i32 to vector<8x256xi32>
    %54 = arith.cmpi slt, %34, %53 : vector<8x256xi32>
    %55 = arith.andi %52, %54 : vector<8x256xi1>
    %cst_27 = arith.constant 0.000000e+00 : f32
    %56 = vector.broadcast %cst_27 : f32 to vector<8x256xf32>
    %57 = arith.select %55, %33, %56 : vector<8x256xi1>, vector<8x256xf32>
    %cst_28 = arith.constant dense<0.000000e+00> : vector<8xf32>
    %58 = vector.multi_reduction <add>, %57, %cst_28 [1] : vector<8x256xf32> to vector<8xf32>
    %59 = vector.shape_cast %58 : vector<8xf32> to vector<8x1xf32>
    %cst_29 = arith.constant 0.00510204071 : f32
    %60 = vector.broadcast %cst_29 : f32 to vector<8x1xf32>
    %61 = arith.mulf %59, %60 : vector<8x1xf32>
    %62 = arith.mulf %57, %57 : vector<8x256xf32>
    %cst_30 = arith.constant dense<0.000000e+00> : vector<8xf32>
    %63 = vector.multi_reduction <add>, %62, %cst_30 [1] : vector<8x256xf32> to vector<8xf32>
    %64 = vector.shape_cast %63 : vector<8xf32> to vector<8x1xf32>
    %cst_31 = arith.constant 0.00510204071 : f32
    %65 = vector.broadcast %cst_31 : f32 to vector<8x1xf32>
    %66 = arith.mulf %64, %65 : vector<8x1xf32>
    %67 = arith.mulf %61, %61 : vector<8x1xf32>
    %68 = arith.subf %66, %67 : vector<8x1xf32>
    %cst_32 = arith.constant 0.000000e+00 : f32
    %69 = vector.broadcast %cst_32 : f32 to vector<8x1xf32>
    %70 = arith.maximumf %68, %69 : vector<8x1xf32>
    %71 = vector.broadcast %61 : vector<8x1xf32> to vector<8x256xf32>
    %72 = arith.subf %33, %71 : vector<8x256xf32>
    %cst_33 = arith.constant 9.99999974E-6 : f32
    %73 = vector.broadcast %cst_33 : f32 to vector<8x1xf32>
    %74 = arith.addf %70, %73 : vector<8x1xf32>
    %75 = math.rsqrt %74 : vector<8x1xf32>
    %76 = vector.broadcast %75 : vector<8x1xf32> to vector<8x256xf32>
    %77 = arith.mulf %72, %76 : vector<8x256xf32>
    %c0_34 = arith.constant 0 : index
    %c0_35 = arith.constant 0 : index
    %c0_36 = arith.constant 0 : index
    %78 = vector.load %arg4[%c0_34, %c0_35, %c0_36] : memref<1x8x256xf32, #tpu.memory_space<vmem>>, vector<1x8x256xf32>
    %79 = vector.shape_cast %78 : vector<1x8x256xf32> to vector<8x256xf32>
    %80 = vector.shape_cast %77 : vector<8x256xf32> to vector<1x8x256xf32>
    tpu.vector_store %arg4[%c0_34, %c0_35, %c0_36], %80 {strides = array<i32>} : memref<1x8x256xf32, #tpu.memory_space<vmem>>, vector<1x8x256xf32>,
    return
  }
  func.func @transform_0(%arg0: i32) -> (i32, i32, i32) {
    %c0_i32 = arith.constant 0 : i32
    %c0_i32_0 = arith.constant 0 : i32
    %c0_i32_1 = arith.constant 0 : i32
    return %arg0, %c0_i32, %c0_i32_0 : i32, i32, i32
  }
  func.func @transform_1(%arg0: i32) -> (i32, i32) {
    %c0_i32 = arith.constant 0 : i32
    %c0_i32_0 = arith.constant 0 : i32
    %c0_i32_1 = arith.constant 0 : i32
    return %c0_i32, %c0_i32_0 : i32, i32
  }
  func.func @transform_2(%arg0: i32) -> (i32, i32) {
    %c0_i32 = arith.constant 0 : i32
    %c0_i32_0 = arith.constant 0 : i32
    %c0_i32_1 = arith.constant 0 : i32
    return %c0_i32, %c0_i32_0 : i32, i32
  }
  func.func @transform_3(%arg0: i32) -> (i32, i32, i32) {
    %c0_i32 = arith.constant 0 : i32
    %c0_i32_0 = arith.constant 0 : i32
    %c0_i32_1 = arith.constant 0 : i32
    return %arg0, %c0_i32, %c0_i32_0 : i32, i32, i32
  }
}

</mosaic_0001>

<bundles_post_ra>
// kernel: gated_conv.1
= control target key start
LH: loop header
LB: loop body
LE: loop exit
PB: predicated region body
PF: predicated region fallthrough
CT: control target
= control target key end

     0   :  { %s607_s12 = smov 0   ;;  %s659_s0 = inlined_call_operand.vmem [shape: bf16[2,4,384], index: 0, kind: input, shape index: {}]   ;;  %s660_s1 = inlined_call_operand.vmem [shape: bf16[16,36], index: 1, kind: input, shape index: {}]   ;;  %s661_s2 = inlined_call_operand.vmem [shape: f32[16,1], index: 2, kind: input, shape index: {}]   ;;  %s662_s3 = inlined_call_operand.vmem [shape: f32[2,8,256], index: 3, kind: output, shape index: {}]  }
   0x1 LB: > { %s518_s13 = sadd.s32 4294967295, %s575_s12   ;;  %p522_p0 = scmp.ge.s32.totalorder %s575_s12, 1  ;;  %s575_s12 = sphi %s607_s12, %s13_s12  }
   0x2   : > { %p137_p1 = scmp.lt.s32.totalorder %s575_s12, 3 }
   0x4   : > { %p138_p2 = pnand %p522_p0, %p137_p1 }
   0x5   : > { %p161_p3 = scmp.lt.s32.totalorder (!%p138_p2), %s518_s13, 1  ;;  %v188_v0 = vlaneseq (!%p138_p2)  ;;  %v577_v1 = vmov (!%p138_p2), 1983009808   ;;  %s578_s18 = smov (!%p138_p2), 126   ;;  %v584_v17 = vmov (!%p138_p2), 0   ;;  %v321_v18 = vld [vmem:[%s661_s2] sm:$0xff] (!%p138_p2) }
   0x6   : > { %141 = sbr.rel (%p138_p2) target bundleno = 598 (0x256), region = 32  ;;  %v186_v2 = vunpack.c.l.s4 (!%p138_p2), %v577_v1  ;;  %s579_s19 = smov (!%p138_p2), 127   ;;  %380 = vmatprep.mubr.bf16.mxu0 (!%p138_p2), %v584_v17  ;;  %555 = vset.pattern.permute.xlu1 (!%p138_p2), %v584_v17  ;;  %v322_v19 = vld [vmem:[%s661_s2 + $0x8] sm:$0xff] (!%p138_p2)  ;;  %vm206_vm0 = vcmask (!%p138_p2), 1039360   ;;  %vm284_vm1 = vcmask (!%p138_p2), 1041408   ;;  %vm235_vm2 = vcmask (!%p138_p2), 916480  }
   0x7   : > { %v189_v3 = vshrl.u32 (!%p138_p2), %v188_v0, 7  ;;  %s580_s20 = smov (!%p138_p2), 112   ;;  %s581_s21 = smov (!%p138_p2), 111   ;;  %554 = vset.pattern.permute.xlu0 (!%p138_p2), %v584_v17  ;;  %vm225_vm3 = vcmask (!%p138_p2), 1031168   ;;  %vm296_vm4 = vcmask (!%p138_p2), 1045504   ;;  %vm291_vm5 = vcmask (!%p138_p2), 1043456  }
   0x8   : > { %v187_v4 = vunpack.c.0.s8 (!%p138_p2), %v186_v2  ;;  %s582_s22 = smov (!%p138_p2), 110   ;;  %s583_s23 = smov (!%p138_p2), 96   ;;  %vm254_vm6 = vcmask (!%p138_p2), 900096   ;;  %vm263_vm7 = vcmask (!%p138_p2), 785408   ;;  %vm245_vm8 = vcmask (!%p138_p2), 908288  }
   0x9   : > { %s585_s24 = smov (!%p138_p2), 95   ;;  %s586_s25 = smov (!%p138_p2), 94   ;;  %vm272_vm9 = vcmask (!%p138_p2), 777216   ;;  %vm281_vm10 = vcmask (!%p138_p2), 769024   ;;  %vm338_vm11 = vcmask (!%p138_p2), 293888  }
   0xa   : > { %v190_v5 = vsub.s32 (!%p138_p2), %v187_v4, %v189_v3 }
   0xd   : > { %s664_s13 = smov (!%p161_p3, %s518_s13), 1 }
   0xe   : > { %s535_s14 = smul.u32 6, %s664_s13  ;;  %s534_s5 = sshll.u32 %s664_s13, 4 }
   0xf   : > { %s170_s8 = scalar_lea.vmem %s662_s3, %s534_s5 }
  0x10   : > { %s622_s17 = scalar_lea.vmem %s659_s0, %s535_s14 }
  0x11   : > { %v173_v6 = vld [vmem:[%s622_s17] sm:$0x3f] }
  0x12   : > { %v198_v7 = vrot.slane %v173_v6, %v190_v5  ;;  %v184_v8 = vcombine.low %v173_v6, %v173_v6  ;;  %v209_v10 = vcombine.high %v173_v6, %v173_v6  ;;  %v526_v24 = vld.sshfl [vmem:[%s622_s17] sm:$0x33 pattern:$0x76325410] }
  0x13   : > { %v182_v27 = vcombine.high %v526_v24, %v526_v24 }
  0x14   : > { %221 = vrot.lane.b32.xlu1 %v198_v7, %s578_s18  ;;  %204 = vrot.lane.b32.xlu0 %v198_v7, %s579_s19  ;;  %v191_v9 = vrot.slane %v184_v8, %v190_v5  ;;  %v217_v11 = vcombine.low %v198_v7, %v198_v7  ;;  %v216_v13 = vrot.slane %v209_v10, %v190_v5 }
  0x15   : > { %v238_v15 = vcombine.high %v198_v7, %v198_v7 }
  0x16   : > { %v199_v12 = vcombine.high %v191_v9, %v191_v9  ;;  %v218_v14 = vcombine.low %v216_v13, %v216_v13  ;;  %v228_v16 = vcombine.low %v191_v9, %v191_v9 }
  0x18   : > { %231 = vrot.lane.b32.xlu0 %v191_v9, %s580_s20  ;;  %200 = vrot.lane.b32.xlu1 %v191_v9, %s579_s19 }
  0x1c   : > { %219 = vrot.lane.b32.xlu1 %v217_v11, %s578_s18  ;;  %202 = vrot.lane.b32.xlu0 %v199_v12, %s579_s19 }
  0x20   : > { %233 = vrot.lane.b32.xlu1 %v217_v11, %s580_s20  ;;  %223 = vrot.lane.b32.xlu0 %v218_v14, %s578_s18 }
  0x24   : > { %241 = vrot.lane.b32.xlu1 %v238_v15, %s581_s21  ;;  %229 = vrot.lane.b32.xlu0 %v228_v16, %s580_s20 }
  0x28   : > { %250 = vrot.lane.b32.xlu1 %v199_v12, %s582_s22  ;;  %243 = vrot.lane.b32.xlu0 %v216_v13, %s581_s21  ;;  %v558_v12 = vld [vmem:[%s660_s1] sm:$0xff]  }
  0x2c   : > { %239 = vrot.lane.b32.xlu1 %v198_v7, %s581_s21  ;;  %252 = vrot.lane.b32.xlu0 %v198_v7, %s582_s22 }
  0x30   : > { %259 = vrot.lane.b32.xlu1 %v198_v7, %s583_s23  ;;  %248 = vrot.lane.b32.xlu0 %v191_v9, %s582_s22 }
  0x34   : > { %257 = vrot.lane.b32.xlu1 %v217_v11, %s583_s23  ;;  %261 = vrot.lane.b32.xlu0 %v218_v14, %s583_s23 }
  0x38   : > { %270 = vrot.lane.b32.xlu1 %v217_v11, %s585_s24  ;;  %268 = vrot.lane.b32.xlu0 %v191_v9, %s585_s24 }
  0x3c   : > { %275 = vrot.lane.b32.xlu1 %v198_v7, %s586_s25  ;;  %266 = vrot.lane.b32.xlu0 %v228_v16, %s585_s24 }
  0x40   : > { %279 = vrot.lane.b32.xlu1 %v216_v13, %s586_s25  ;;  %277 = vrot.lane.b32.xlu0 %v238_v15, %s586_s25 }
  0x44   : > { %325 = vperm.xlu1 %555, %v321_v18   ;;  %330 = vperm.xlu0 %554, %v322_v19  }
  0x86   : > { %v222_v20 = vpop.permute.xlu1 %221  ;;  %v205_v21 = vpop.permute.xlu0 %204 }
  0x8a   : > { %v232_v22 = vpop.permute.xlu0 %231  ;;  %v201_v23 = vpop.permute.xlu1 %200 }
  0x8e   : > { %v220_v25 = vpop.permute.xlu1 %219  ;;  %v203_v26 = vpop.permute.xlu0 %202 }
  0x8f   : > { %v208_v28 = vsel %vm206_vm0, %v203_v26, %v205_v21  ;;  %v207_v29 = vsel %vm206_vm0, %v201_v23, %v203_v26  ;;  %v226_v35 = vsel %vm225_vm3, %v220_v25, %v222_v20 }
  0x90   : > { %v290_v32 = vsel %vm284_vm1, %v182_v27, %v208_v28  ;;  %v287_v36 = vsel %vm284_vm1, %v526_v24, %v207_v29 }
  0x91   : > { %v293_v42 = vsel %vm291_vm5, %v287_v36, %v226_v35 }
  0x92   : > { %v234_v30 = vpop.permute.xlu1 %233  ;;  %v224_v31 = vpop.permute.xlu0 %223 }
  0x93   : > { %v237_v33 = vsel %vm235_vm2, %v232_v22, %v234_v30  ;;  %v227_v34 = vsel %vm225_vm3, %v222_v20, %v224_v31 }
  0x94   : > { %v295_v37 = vsel %vm291_vm5, %v290_v32, %v227_v34 }
  0x95   : > { %v301_v38 = vsel %vm296_vm4, %v295_v37, %v237_v33 }
  0x96   : > { %v242_v39 = vpop.permute.xlu1 %241  ;;  %v230_v40 = vpop.permute.xlu0 %229  ;;  %348 = vmatprep.subr.bf16.mxu0 %v301_v38 }
  0x97   : > { %v236_v41 = vsel %vm235_vm2, %v230_v40, %v232_v22  ;;  %v408_v22 = vand.u32 127, %v188_v0 }
  0x98   : > { %v298_v43 = vsel %vm296_vm4, %v293_v42, %v236_v41 }
  0x99   : > { %349 = vmatpush1.bf16.msra.mxu0 %v298_v43  ;;  %v409_v27 = vadd.s32 128, %v408_v22  ;;  %v414_v32 = vand.u32 15, %v408_v22 }
  0x9a   : > { %v251_v44 = vpop.permute.xlu1 %250  ;;  %v244_v45 = vpop.permute.xlu0 %243 }
  0x9b   : > { %v247_v54 = vsel %vm245_vm8, %v242_v39, %v244_v45  ;;  %v421_v29 = vand.u32 15, %v409_v27  ;;  %vm437_vm13 = vcmp.lt.s32.totalorder %v409_v27, 224  ;;  %vm434_vm14 = vcmp.lt.s32.totalorder %v414_v32, 14 }
  0x9d   : > { %vm435_vm12 = vcmp.lt.s32.totalorder %v421_v29, 14 }
  0x9e   : > { %v240_v46 = vpop.permute.xlu1 %239  ;;  %v253_v47 = vpop.permute.xlu0 %252  ;;  %vm439_vm15 = vmand %vm435_vm12, %vm437_vm13 }
  0x9f   : > { %v256_v52 = vsel %vm254_vm6, %v251_v44, %v253_v47  ;;  %v246_v63 = vsel %vm245_vm8, %v240_v46, %v242_v39 }
  0xa0   : > { %v308_v55 = vsel %vm284_vm1, %v247_v54, %v256_v52 }
  0xa2   : > { %v260_v48 = vpop.permute.xlu1 %259  ;;  %v249_v49 = vpop.permute.xlu0 %248 }
  0xa3   : > { %v255_v58 = vsel %vm254_vm6, %v249_v49, %v251_v44 }
  0xa4   : > { %v305_v1 = vsel %vm284_vm1, %v246_v63, %v255_v58 }
  0xa6   : > { %v258_v50 = vpop.permute.xlu1 %257  ;;  %v262_v51 = vpop.permute.xlu0 %261 }
  0xa7   : > { %v265_v53 = vsel %vm263_vm7, %v260_v48, %v262_v51  ;;  %v264_v61 = vsel %vm263_vm7, %v258_v50, %v260_v48 }
  0xa8   : > { %v312_v60 = vsel %vm291_vm5, %v308_v55, %v265_v53  ;;  %v310_v5 = vsel %vm291_vm5, %v305_v1, %v264_v61 }
  0xaa   : > { %v271_v56 = vpop.permute.xlu1 %270  ;;  %v269_v57 = vpop.permute.xlu0 %268 }
  0xab   : > { %v274_v59 = vsel %vm272_vm9, %v269_v57, %v271_v56 }
  0xac   : > { %v317_v62 = vsel %vm296_vm4, %v312_v60, %v274_v59 }
  0xad   : > { %350 = vmatprep.subr.bf16.mxu0 %v317_v62 }
  0xae   : > { %v276_v2 = vpop.permute.xlu1 %275  ;;  %v267_v3 = vpop.permute.xlu0 %266 }
  0xaf   : > { %v273_v4 = vsel %vm272_vm9, %v267_v3, %v269_v57 }
  0xb0   : > { %v314_v6 = vsel %vm296_vm4, %v310_v5, %v273_v4 }
  0xb1   : > { %351 = vmatpush1.bf16.msra.mxu0 %v314_v6 }
  0xb2   : > { %v280_v7 = vpop.permute.xlu1 %279  ;;  %v278_v8 = vpop.permute.xlu0 %277 }
  0xb3   : > { %v282_v9 = vsel %vm281_vm10, %v276_v2, %v278_v8  ;;  %v283_v10 = vsel %vm281_vm10, %v278_v8, %v280_v7 }
  0xb4   : > { %528 = vmatprep.subr.msk.bf16.mxu0 %vm284_vm1, %v283_v10  ;;  %v343_v11 = vsel %vm284_vm1, %v282_v9, 0 }
  0xb5   : > { %353 = vmatpush1.bf16.msra.mxu0 %v343_v11 }
  0xb8   : > { %529 = vmatmul.mubr.msk.bf16.vlgmr.msra.gmra.mrb[0].mxu0 %vm338_vm11, %v558_v12 }
  0xc3   : > { %v331_v14 = vpop.permute.xlu0 %330  ;;  %v326_v28 = vpop.permute.xlu1 %325 }
 0x18b   : > { %v382_v13 = vpop.f32.mrb[0].mxu0 }
 0x18c   : > { %v384_v15 = vpop.f32.mrb[1].mxu0  ;;  %v383_v30 = vadd.f32 %v382_v13, %v326_v28 }
 0x18d   : > { %v386_v16 = vpop.f32.mrb[2].mxu0  ;;  %v385_v31 = vadd.f32 %v384_v15, %v326_v28 }
 0x18e   : > { %v387_v17 = vadd.f32 %v386_v16, %v331_v14  ;;  %v388_v18 = vpop.f32.mrb[3].mxu0  ;;  %v391_v33 = vmax.f32 %v383_v30, 0.0 }
 0x18f   : > { %v389_v19 = vadd.f32 %v388_v18, %v331_v14  ;;  %v392_v35 = vmax.f32 %v385_v31, 0.0 }
 0x190   : > { %v530_v20 = vmul.f32 -1.442695, %v387_v17 }
 0x191   : > { %v531_v21 = vmul.f32 -1.442695, %v389_v19 }
 0x192   : > { %559 = vpow2.f32 %v530_v20 }
 0x193   : > { %561 = vpow2.f32 %v531_v21 }
 0x19c   : > { %v560_v23 = vpop.eup %559 }
 0x19d   : > { %v562_v24 = vpop.eup %561  ;;  %v399_v25 = vadd.f32 1.0, %v560_v23 }
 0x19e   : > { %v400_v26 = vadd.f32 1.0, %v562_v24 }
 0x19f   : > { %563 = vrcp.f32 %v399_v25 }
 0x1a0   : > { %565 = vrcp.f32 %v400_v26 }
 0x1a9   : > { %v564_v34 = vpop.eup %563 }
 0x1aa   : > { %v566_v36 = vpop.eup %565  ;;  %v405_v0 = vmul.f32 %v564_v34, %v391_v33 }
 0x1ab   : > { %v406_v37 = vmul.f32 %v566_v36, %v392_v35 }
 0x1ac   : > { %v440_v38 = vsel %vm434_vm14, %v405_v0, 0.0 }
 0x1ad   : > { %v441_v39 = vsel %vm439_vm15, %v406_v37, 0.0  ;;  %v446_v40 = vmul.f32 %v440_v38, %v440_v38 }
 0x1ae   : > { %v442_v41 = vadd.f32 %v441_v39, %v440_v38  ;;  %v447_v42 = vmul.f32 %v441_v39, %v441_v39 }
 0x1b0   : > { %443 = vadd.xlane.f32.xlu1 %v442_v41  ;;  %v448_v43 = vadd.f32 %v447_v42, %v446_v40 }
 0x1b2   : > { %449 = vadd.xlane.f32.xlu0 %v448_v43 }
 0x23d   : > { %v444_v44 = vpop.xlane.xlu1 %443 }
 0x23e   : > { %v445_v45 = vmul.f32 0.0051020407, %v444_v44 }
 0x23f   : > { %v450_v46 = vpop.xlane.xlu0 %449 }
 0x240   : > { %v451_v47 = vmul.f32 0.0051020407, %v450_v46  ;;  %v452_v48 = vmul.f32 %v445_v45, %v445_v45  ;;  %v455_v52 = vsub.f32 %v405_v0, %v445_v45  ;;  %v456_v53 = vsub.f32 %v406_v37, %v445_v45 }
 0x242   : > { %v453_v49 = vsub.f32 %v451_v47, %v452_v48 }
 0x244   : > { %v454_v50 = vmax.f32 %v453_v49, 0.0 }
 0x246   : > { %v457_v51 = vadd.f32 1e-05, %v454_v50 }
 0x248   : > { %567 = vrsqrt.f32 %v457_v51 }
 0x252   : > { %v568_v54 = vpop.eup %567 }
 0x253   : > { %v459_v55 = vmul.f32 %v568_v54, %v455_v52  ;;  %v460_v56 = vmul.f32 %v568_v54, %v456_v53 }
 0x255   : > { %461 = vst [vmem:[%s170_s8] sm:$0xff] %v459_v55  ;;  %462 = vst [vmem:[%s170_s8 + $0x8] sm:$0xff] %v460_v56 }
 0x256 PF: > { %s13_s12 = sadd.s32 1, %s575_s12  }
 0x257   : > { %p10_p4 = scmp.ge.s32.totalorder %s13_s12, 4  }
 0x259   :  { %12 = sbr.rel (!%p10_p4) target bundleno = 1 (0x1), region = 62 }

</bundles_post_ra>
